<compile_context>
chip_gen: v6e
topology: v6e:2x2x1
jax: 0.10.0
libtpu: 0.0.40
codegen_flags: <defaults>
</compile_context>

<pallas_src>
import functools
import math

import jax
import jax.numpy as jnp
from jax.experimental import pallas as pl
from jax.experimental.pallas import tpu as pltpu


def lambda_init_fn(depth):
    return 0.8 - 0.6 * math.exp(-0.3 * depth)


def _round_up(x, m):
    return (x + m - 1) // m * m


def _choose_tile(dim, target):
    """Return (tile, padded_dim). tile == full dim when dim <= target,
    otherwise tile == target (targets are multiples of 128)."""
    if dim <= target:
        return dim, dim
    return target, _round_up(dim, target)


# ---------------------------------------------------------------------------
# Tiled / pipelined matmul for the q/k/v linear projections (no bias).
# Operands are cast to bf16 for the MXU; accumulation is f32; an optional
# static `scale` is applied in the finalize epilogue (used to fold the
# attention scaling into the q projection).
# ---------------------------------------------------------------------------
def _matmul_kernel(x_ref, w_ref, o_ref, acc_ref, *, scale):
    @pl.when(pl.program_id(2) == 0)
    def _():
        acc_ref[...] = jnp.zeros_like(acc_ref)

    acc_ref[...] += jnp.dot(x_ref[...], w_ref[...],
                            preferred_element_type=jnp.float32)

    @pl.when(pl.program_id(2) == pl.num_programs(2) - 1)
    def _():
        acc = acc_ref[...]
        if scale is not None:
            acc = acc * scale
        o_ref[...] = acc.astype(o_ref.dtype)


def pallas_matmul(x, w, out_dtype=None, scale=None,
                  tm=512, tn=512, tk=1024, operand_dtype=jnp.bfloat16):
    out_dtype = out_dtype or x.dtype
    if operand_dtype is not None:
        x = x.astype(operand_dtype)
        w = w.astype(operand_dtype)

    M, K = x.shape
    K2, N = w.shape
    assert K == K2

    tm, Mp = _choose_tile(M, tm)
    tn, Np = _choose_tile(N, tn)
    tk, Kp = _choose_tile(K, tk)

    if (Mp, Kp) != (M, K):
        x = jnp.pad(x, ((0, Mp - M), (0, Kp - K)))
    if (Kp, Np) != (K, N):
        w = jnp.pad(w, ((0, Kp - K), (0, Np - N)))

    kernel = functools.partial(_matmul_kernel, scale=scale)
    out = pl.pallas_call(
        kernel,
        out_shape=jax.ShapeDtypeStruct((Mp, Np), out_dtype),
        grid=(Mp // tm, Np // tn, Kp // tk),
        in_specs=[
            pl.BlockSpec((tm, tk), lambda i, j, k: (i, k)),
            pl.BlockSpec((tk, tn), lambda i, j, k: (k, j)),
        ],
        out_specs=pl.BlockSpec((tm, tn), lambda i, j, k: (i, j)),
        scratch_shapes=[pltpu.VMEM((tm, tn), jnp.float32)],
        compiler_params=pltpu.CompilerParams(
            dimension_semantics=("parallel", "parallel", "arbitrary")),
    )(x, w)
    if (Mp, Np) != (M, N):
        out = out[:M, :N]
    return out


# ---------------------------------------------------------------------------
# Flash-style differential attention, KV-group batched.
#
#   grid = (B, Hkv, T_blocks, S_blocks); KV axis is last & "arbitrary".
#   Per grid step the resident blocks are:
#     q : (1, 2*n_rep, t_blk, Dh)   expanded q heads e = 2r + c of kv group j
#     k : (1, 2,       s_blk, Dh)   the two un-repeated k-component heads 2j,2j+1
#     v : (1, 1,       s_blk, 2Dh)  un-repeated v head j
#   Expanded head e uses local k head e // n_rep (0 for e < n_rep else 1),
#   which reproduces torch.repeat_interleave exactly for any n_rep.
#   Epilogue: out_r = RMSNorm(acc[2r]/l[2r] - lambda_full * acc[2r+1]/l[2r+1])
#             * (1 - lambda_init)
# ---------------------------------------------------------------------------
def _diff_flash_kernel(lam_ref, q_ref, k_ref, v_ref, gamma_ref, o_ref,
                       m_sc, l_sc, acc_sc, *,
                       n_rep, lambda_init, s_blk, src_len, needs_mask):
    s_idx = pl.program_id(3)

    @pl.when(s_idx == 0)
    def _():
        m_sc[...] = jnp.full_like(m_sc, -jnp.inf)
        l_sc[...] = jnp.zeros_like(l_sc)
        acc_sc[...] = jnp.zeros_like(acc_sc)

    k0 = k_ref[0, 0]                       # (s_blk, Dh) bf16
    k1 = k_ref[0, 1]                       # (s_blk, Dh) bf16
    v = v_ref[0, 0]                        # (s_blk, 2*Dh) bf16

    if needs_mask:
        col = jax.lax.broadcasted_iota(jnp.int32, (1, s_blk), 1) + s_idx * s_blk
        col_ok = col < src_len

    dn_qk = (((1,), (1,)), ((), ()))       # contract last dim of q with last of k
    dn_pv = (((1,), (0,)), ((), ()))

    for e in range(2 * n_rep):             # static unroll over expanded q heads
        q_e = q_ref[0, e]                  # (t_blk, Dh) bf16, pre-scaled by `scaling`
        k_e = k0 if e < n_rep else k1
        s = jax.lax.dot_general(q_e, k_e, dn_qk,
                                preferred_element_type=jnp.float32)   # (t_blk, s_blk)
        if needs_mask:
            s = jnp.where(col_ok, s, -1e30)

        m_prev = m_sc[e]
        m_new = jnp.maximum(m_prev, jnp.max(s, axis=-1, keepdims=True))
        alpha = jnp.exp(m_prev - m_new)
        p = jnp.exp(s - m_new)                                        # (t_blk, s_blk)
        l_sc[e] = alpha * l_sc[e] + jnp.sum(p, axis=-1, keepdims=True)
        pv = jax.lax.dot_general(p.astype(v.dtype), v, dn_pv,
                                 preferred_element_type=jnp.float32)  # (t_blk, 2*Dh)
        acc_sc[e] = alpha * acc_sc[e] + pv
        m_sc[e] = m_new

    @pl.when(s_idx == pl.num_programs(3) - 1)
    def _():
        lam = lam_ref[0, 0]
        g = gamma_ref[...]                 # (1, 2*Dh) f32
        out_scale = 1.0 - lambda_init
        for r in range(n_rep):             # static unroll over q heads of the group
            a1 = acc_sc[2 * r] / l_sc[2 * r]          # exact normalization
            a2 = acc_sc[2 * r + 1] / l_sc[2 * r + 1]
            attn = a1 - lam * a2                       # (t_blk, 2*Dh) f32
            # RMSNorm(2*Dh, eps=1e-5, elementwise_affine)
            ms = jnp.mean(attn * attn, axis=-1, keepdims=True)
            normed = attn * jax.lax.rsqrt(ms + 1e-5) * g
            o_ref[0, r] = (normed * out_scale).astype(o_ref.dtype)


def pallas_diff_attention(q, k, v, gamma, lambda_full, *, n_rep,
                          lambda_init, out_dtype, s_target=512):
    """
    q:     (B, 2*H,   T, Dh)   expanded q heads, already scaled by `scaling`
    k:     (B, 2*Hkv, S, Dh)   un-repeated (GQA handled via kv-group blocking)
    v:     (B, Hkv,   S, 2*Dh) un-repeated
    gamma: (1, 2*Dh) f32
    lambda_full: (1, 1) f32 scalar
    """
    B, H2, T, Dh = q.shape
    Dv = 2 * Dh
    H = H2 // 2
    Hkv = k.shape[1] // 2
    S = k.shape[2]
    assert H == Hkv * n_rep

    # keep rows-per-step (2 * n_rep * t_blk) around ~1024
    if n_rep <= 1:
        t_target = 512
    elif n_rep == 2:
        t_target = 256
    else:
        t_target = 128

    t_blk, Tp = _choose_tile(T, t_target)
    s_blk, Sp = _choose_tile(S, s_target)
    if Tp != T:
        q = jnp.pad(q, ((0, 0), (0, 0), (0, Tp - T), (0, 0)))
    if Sp != S:
        k = jnp.pad(k, ((0, 0), (0, 0), (0, Sp - S), (0, 0)))
        v = jnp.pad(v, ((0, 0), (0, 0), (0, Sp - S), (0, 0)))
    needs_mask = Sp != S   # only the ragged-S case needs the column mask

    kernel = functools.partial(
        _diff_flash_kernel, n_rep=n_rep, lambda_init=lambda_init,
        s_blk=s_blk, src_len=S, needs_mask=needs_mask)

    out = pl.pallas_call(
        kernel,
        out_shape=jax.ShapeDtypeStruct((B, H, Tp, Dv), out_dtype),
        grid=(B, Hkv, Tp // t_blk, Sp // s_blk),
        in_specs=[
            pl.BlockSpec(memory_space=pltpu.MemorySpace.SMEM),              # lambda_full
            pl.BlockSpec((1, 2 * n_rep, t_blk, Dh),
                         lambda b, j, t, s: (b, j, t, 0)),                  # q group
            pl.BlockSpec((1, 2, s_blk, Dh),
                         lambda b, j, t, s: (b, j, s, 0)),                  # k pair (single stream)
            pl.BlockSpec((1, 1, s_blk, Dv),
                         lambda b, j, t, s: (b, j, s, 0)),                  # v
            pl.BlockSpec((1, Dv), lambda b, j, t, s: (0, 0)),               # gamma
        ],
        out_specs=pl.BlockSpec((1, n_rep, t_blk, Dv),
                               lambda b, j, t, s: (b, j, t, 0)),
        scratch_shapes=[
            pltpu.VMEM((2 * n_rep, t_blk, 1), jnp.float32),   # running max
            pltpu.VMEM((2 * n_rep, t_blk, 1), jnp.float32),   # running sum
            pltpu.VMEM((2 * n_rep, t_blk, Dv), jnp.float32),  # accumulator
        ],
        compiler_params=pltpu.CompilerParams(
            dimension_semantics=("parallel", "parallel", "parallel", "arbitrary")),
    )(lambda_full, q, k, v, gamma)

    if Tp != T:
        out = out[:, :, :T]
    return out


# ---------------------------------------------------------------------------
# Parameter init (deterministic, synthetic) and forward glue.
# Weights are stored pre-transposed once, as (in_features, out_features).
# ---------------------------------------------------------------------------
def init_params(key, embed_dim, num_heads, num_kv_heads):
    n_rep = num_heads // num_kv_heads
    head_dim = embed_dim // num_heads // 2
    k1, k2, k3, k4, k5, k6, k7 = jax.random.split(key, 7)
    # created in PyTorch Linear layout (out, in), transposed ONCE at init
    wq = jax.random.normal(k1, (embed_dim, embed_dim), jnp.float32) * 0.06
    wk = jax.random.normal(k2, (embed_dim // n_rep, embed_dim), jnp.float32) * 0.06
    wv = jax.random.normal(k3, (embed_dim // n_rep, embed_dim), jnp.float32) * 0.06
    return {
        "q_proj_t": wq.T,                      # (in, out)
        "k_proj_t": wk.T,
        "v_proj_t": wv.T,
        "lambda_q1": jax.random.normal(k4, (head_dim,), jnp.float32) * 0.1,
        "lambda_k1": jax.random.normal(k5, (head_dim,), jnp.float32) * 0.1,
        "lambda_q2": jax.random.normal(k6, (head_dim,), jnp.float32) * 0.1,
        "lambda_k2": jax.random.normal(k7, (head_dim,), jnp.float32) * 0.1,
        "subln_weight": jnp.ones((2 * head_dim,), jnp.float32),
    }


def multihead_diff_attn_forward(params, q, k, v, *, embed_dim, depth,
                                num_heads, num_kv_heads,
                                compute_dtype=jnp.bfloat16):
    # TODO(synk): attn_mask (e.g. causal) path of the PyTorch module is not
    # implemented; this matches the default attn_mask=None behaviour only.
    n_rep = num_heads // num_kv_heads
    head_dim = embed_dim // num_heads // 2
    scaling = head_dim ** -0.5
    lambda_init = lambda_init_fn(depth)

    bsz, tgt_len, _ = q.shape
    _, src_len, _ = k.shape
    out_dtype = q.dtype

    # ---- projections (bf16 tiled Pallas matmuls); scaling folded into q ----
    qp = pallas_matmul(q.reshape(bsz * tgt_len, embed_dim), params["q_proj_t"],
                       out_dtype=compute_dtype, scale=scaling)
    kp = pallas_matmul(k.reshape(bsz * src_len, embed_dim), params["k_proj_t"],
                       out_dtype=compute_dtype)
    vp = pallas_matmul(v.reshape(bsz * src_len, embed_dim), params["v_proj_t"],
                       out_dtype=compute_dtype)

    # Head-major layouts (expanded q heads; un-repeated k/v heads).
    qh = qp.reshape(bsz, tgt_len, 2 * num_heads, head_dim).transpose(0, 2, 1, 3)
    kh = kp.reshape(bsz, src_len, 2 * num_kv_heads, head_dim).transpose(0, 2, 1, 3)
    vh = vp.reshape(bsz, src_len, num_kv_heads, 2 * head_dim).transpose(0, 2, 1, 3)

    lambda_1 = jnp.exp(jnp.sum(params["lambda_q1"] * params["lambda_k1"]))
    lambda_2 = jnp.exp(jnp.sum(params["lambda_q2"] * params["lambda_k2"]))
    lambda_full = (lambda_1 - lambda_2 + lambda_init).reshape(1, 1).astype(jnp.float32)

    gamma = params["subln_weight"].reshape(1, 2 * head_dim).astype(jnp.float32)

    attn = pallas_diff_attention(
        qh, kh, vh, gamma, lambda_full,
        n_rep=n_rep, lambda_init=lambda_init, out_dtype=out_dtype)

    # (B, H, T, 2*Dh) -> (B, T, H*2*Dh)
    return attn.transpose(0, 2, 1, 3).reshape(bsz, tgt_len,
                                              num_heads * 2 * head_dim)


# ---------------------------------------------------------------------------
# Pure-JAX f32 reference (mirrors the PyTorch forward) for a sanity check.
# ---------------------------------------------------------------------------
def reference_forward(params, q, k, v, *, embed_dim, depth, num_heads, num_kv_heads):
    n_rep = num_heads // num_kv_heads
    head_dim = embed_dim // num_heads // 2
    scaling = head_dim ** -0.5
    lambda_init = lambda_init_fn(depth)

    bsz, tgt_len, _ = q.shape
    _, src_len, _ = k.shape

    qp = q.reshape(bsz * tgt_len, embed_dim) @ params["q_proj_t"]
    kp = k.reshape(bsz * src_len, embed_dim) @ params["k_proj_t"]
    vp = v.reshape(bsz * src_len, embed_dim) @ params["v_proj_t"]

    qh = qp.reshape(bsz, tgt_len, 2 * num_heads, head_dim).transpose(0, 2, 1, 3) * scaling
    kh = jnp.repeat(kp.reshape(bsz, src_len, 2 * num_kv_heads, head_dim)
                    .transpose(0, 2, 1, 3), n_rep, axis=1)
    vh = jnp.repeat(vp.reshape(bsz, src_len, num_kv_heads, 2 * head_dim)
                    .transpose(0, 2, 1, 3), n_rep, axis=1)

    s = jnp.einsum("bhtd,bhsd->bhts", qh, kh)
    p = jax.nn.softmax(s.astype(jnp.float32), axis=-1)

    lambda_1 = jnp.exp(jnp.sum(params["lambda_q1"] * params["lambda_k1"]))
    lambda_2 = jnp.exp(jnp.sum(params["lambda_q2"] * params["lambda_k2"]))
    lambda_full = lambda_1 - lambda_2 + lambda_init

    p = p.reshape(bsz, num_heads, 2, tgt_len, src_len)
    w = p[:, :, 0] - lambda_full * p[:, :, 1]

    attn = jnp.einsum("bhts,bhsd->bhtd", w, vh)
    ms = jnp.mean(attn * attn, axis=-1, keepdims=True)
    attn = attn * jax.lax.rsqrt(ms + 1e-5) * params["subln_weight"]
    attn = attn * (1.0 - lambda_init)
    return attn.transpose(0, 2, 1, 3).reshape(bsz, tgt_len, num_heads * 2 * head_dim)


if __name__ == "__main__":
    configs = [
        # GQA (n_rep = 2): shared-K groups, the common path
        dict(embed_dim=64, depth=1, num_heads=4, num_kv_heads=2, B=2, T=16, S=16),
        # MHA (n_rep = 1): k-pair per q-head
        dict(embed_dim=64, depth=2, num_heads=4, num_kv_heads=4, B=2, T=16, S=16),
        # multi-KV-block streaming + ragged-S column mask
        dict(embed_dim=64, depth=3, num_heads=4, num_kv_heads=2, B=1, T=48, S=520),
    ]

    key = jax.random.PRNGKey(0)
    for cfg in configs:
        key, kq, kk, kv, kp = jax.random.split(key, 5)
        B, T, S, E = cfg["B"], cfg["T"], cfg["S"], cfg["embed_dim"]
        q = jax.random.normal(kq, (B, T, E), jnp.float32)
        k = jax.random.normal(kk, (B, S, E), jnp.float32)
        v = jax.random.normal(kv, (B, S, E), jnp.float32)

        params = init_params(kp, E, cfg["num_heads"], cfg["num_kv_heads"])

        out = multihead_diff_attn_forward(
            params, q, k, v,
            embed_dim=E, depth=cfg["depth"],
            num_heads=cfg["num_heads"], num_kv_heads=cfg["num_kv_heads"])
        out = jax.block_until_ready(out)

        ref = reference_forward(
            params, q, k, v,
            embed_dim=E, depth=cfg["depth"],
            num_heads=cfg["num_heads"], num_kv_heads=cfg["num_kv_heads"])
        ref = jax.block_until_ready(ref)

        assert out.shape == (B, T, E), out.shape
        # bf16 attention operands vs f32 reference -> bf16-level tolerance
        err = jnp.abs(out - ref)
        max_err = float(jnp.max(err))
        mean_err = float(jnp.mean(err))
        assert max_err < 1e-1 and mean_err < 2e-2, (cfg, max_err, mean_err)

    print("KERNEL_OK")
</pallas_src>

<mosaic_0001>
module attributes {stable_mosaic.version = 11 : i64} {
  func.func @_matmul_kernel(%arg0: i32, %arg1: i32, %arg2: i32, %arg3: memref<32x64xbf16, #tpu.memory_space<vmem>>, %arg4: memref<64x64xbf16, #tpu.memory_space<vmem>>, %arg5: memref<32x64xbf16, #tpu.memory_space<vmem>>, %arg6: memref<32x64xf32, #tpu.memory_space<vmem>>) attributes {dimension_semantics = [#tpu.dimension_semantics<parallel>, #tpu.dimension_semantics<parallel>, #tpu.dimension_semantics<arbitrary>], iteration_bounds = array<i64: 1, 1, 1>, scalar_prefetch = 0 : i64, scratch_operands = 1 : i64, tpu.core_type = #tpu.core_type<tc>, window_params = [{transform_indices = @transform_0, window_bounds = array<i64: 32, 64>}, {transform_indices = @transform_1, window_bounds = array<i64: 64, 64>}, {transform_indices = @transform_2, window_bounds = array<i64: 32, 64>}]} {
    %c0_i32 = arith.constant 0 : i32
    %0 = arith.cmpi eq, %arg2, %c0_i32 : i32
    %1 = arith.extui %0 : i1 to i32
    %c0_i32_0 = arith.constant 0 : i32
    %2 = arith.cmpi ne, %1, %c0_i32_0 : i32
    scf.if %2 {
      %cst_10 = arith.constant 0.000000e+00 : f32
      %12 = vector.broadcast %cst_10 : f32 to vector<32x64xf32>
      %c0_11 = arith.constant 0 : index
      %c0_12 = arith.constant 0 : index
      %13 = vector.load %arg6[%c0_11, %c0_12] : memref<32x64xf32, #tpu.memory_space<vmem>>, vector<32x64xf32>
      tpu.vector_store %arg6[%c0_11, %c0_12], %12 {strides = array<i32>} : memref<32x64xf32, #tpu.memory_space<vmem>>, vector<32x64xf32>,
    } else {
    }
    %c0 = arith.constant 0 : index
    %c0_1 = arith.constant 0 : index
    %3 = vector.load %arg6[%c0, %c0_1] : memref<32x64xf32, #tpu.memory_space<vmem>>, vector<32x64xf32>
    %c0_2 = arith.constant 0 : index
    %c0_3 = arith.constant 0 : index
    %4 = vector.load %arg3[%c0_2, %c0_3] : memref<32x64xbf16, #tpu.memory_space<vmem>>, vector<32x64xbf16>
    %c0_4 = arith.constant 0 : index
    %c0_5 = arith.constant 0 : index
    %5 = vector.load %arg4[%c0_4, %c0_5] : memref<64x64xbf16, #tpu.memory_space<vmem>>, vector<64x64xbf16>
    %cst = arith.constant dense<0.000000e+00> : vector<32x64xf32>
    %6 = tpu.matmul %4, %5, %cst {dimension_numbers = #tpu.dot_dimension_numbers<[1], [0], [0], [1], [0, 0, 1, 1], [], []>} : vector<32x64xbf16>, vector<64x64xbf16>, vector<32x64xf32> -> vector<32x64xf32>
    %7 = arith.addf %3, %6 : vector<32x64xf32>
    %c0_6 = arith.constant 0 : index
    %c0_7 = arith.constant 0 : index
    %8 = vector.load %arg6[%c0_6, %c0_7] : memref<32x64xf32, #tpu.memory_space<vmem>>, vector<32x64xf32>
    tpu.vector_store %arg6[%c0_6, %c0_7], %7 {strides = array<i32>} : memref<32x64xf32, #tpu.memory_space<vmem>>, vector<32x64xf32>,
    %c0_i32_8 = arith.constant 0 : i32
    %9 = arith.cmpi eq, %arg2, %c0_i32_8 : i32
    %10 = arith.extui %9 : i1 to i32
    %c0_i32_9 = arith.constant 0 : i32
    %11 = arith.cmpi ne, %10, %c0_i32_9 : i32
    scf.if %11 {
      %c0_10 = arith.constant 0 : index
      %c0_11 = arith.constant 0 : index
      %12 = vector.load %arg6[%c0_10, %c0_11] : memref<32x64xf32, #tpu.memory_space<vmem>>, vector<32x64xf32>
      %cst_12 = arith.constant 0.353553385 : f32
      %13 = vector.broadcast %cst_12 : f32 to vector<32x64xf32>
      %14 = arith.mulf %12, %13 : vector<32x64xf32>
      %15 = arith.truncf %14 : vector<32x64xf32> to vector<32x64xbf16>
      %c0_13 = arith.constant 0 : index
      %c0_14 = arith.constant 0 : index
      %16 = vector.load %arg5[%c0_13, %c0_14] : memref<32x64xbf16, #tpu.memory_space<vmem>>, vector<32x64xbf16>
      tpu.vector_store %arg5[%c0_13, %c0_14], %15 {strides = array<i32>} : memref<32x64xbf16, #tpu.memory_space<vmem>>, vector<32x64xbf16>,
    } else {
    }
    return
  }
  func.func @transform_0(%arg0: i32, %arg1: i32, %arg2: i32) -> (i32, i32) {
    %c0_i32 = arith.constant 0 : i32
    return %arg0, %arg2 : i32, i32
  }
  func.func @transform_1(%arg0: i32, %arg1: i32, %arg2: i32) -> (i32, i32) {
    %c0_i32 = arith.constant 0 : i32
    return %arg2, %arg1 : i32, i32
  }
  func.func @transform_2(%arg0: i32, %arg1: i32, %arg2: i32) -> (i32, i32) {
    %c0_i32 = arith.constant 0 : i32
    return %arg0, %arg1 : i32, i32
  }
}

</mosaic_0001>

<bundles_post_ra>
// kernel: tpu_custom_call.1
= control target key start
LH: loop header
LB: loop body
LE: loop exit
PB: predicated region body
PF: predicated region fallthrough
CT: control target
= control target key end

     0   :  { %7 = vsyncpa [#allocation4], 0  ;;  %s379_s0 = inlined_call_operand.hbm [shape: bf16[32,64], index: 0, kind: input, shape index: {}]   ;;  %s380_s1 = inlined_call_operand.hbm [shape: bf16[64,64], index: 1, kind: input, shape index: {}]   ;;  %s381_s2 = inlined_call_operand.hbm [shape: bf16[32,64], index: 2, kind: output, shape index: {}]  }
   0x1   :  { %8 = vsyncpa [#allocation7], 0 }
   0x2   :  { %9 = vsyncpa [#allocation5], 0  ;;  %s326_s9 = smov [#allocation3]  }
   0x3   :  { %s15_s10 = sshll.u32 %s326_s9, 4  ;;  %s16_s10 = int_to_ptr.vmem [resolvable:$true] %s15_s10 }
   0x4   :  { %s268_s11 = scalar_lea.vmem %s16_s10, 256  ;;  %p273_p1 = scmp.lt.s32.totalorder %s16_s10, %s16_s10 }
   0x5   :  { %p269_p0 = scmp.ne.s32.totalorder %s16_s10, %s268_s11  ;;  %p274_p2 = scmp.lt.s32.totalorder %s268_s11, %s268_s11 }
   0x7   :  { %p275_p3 = por %p274_p2, %p273_p1 }
   0x9   :  { %p276_p4 = pnand %p275_p3, %p269_p0 }
   0xb   :  { %279 = shalt.err (!%p276_p4)
}
   0xc   :  { %s327_s12 = smov 64   ;;  %s328_s13 = smov 4  }
   0xd   :  { %21 = dma.hbm_to_vmem [thread:$0]  %s379_s0, 256, %s16_s10, [#allocation4], %s327_s12, %s327_s12, %s328_s13  }
   0xe   :  { %s329_s16 = smov [#allocation6]  }
   0xf   :  { %s27_s17 = sshll.u32 %s329_s16, 4  ;;  %s28_s17 = int_to_ptr.vmem [resolvable:$true] %s27_s17 }
  0x10   :  { %s288_s18 = scalar_lea.vmem %s28_s17, 512  ;;  %p293_p6 = scmp.lt.s32.totalorder %s28_s17, %s28_s17 }
  0x11   :  { %p289_p5 = scmp.ne.s32.totalorder %s28_s17, %s288_s18  ;;  %p294_p7 = scmp.lt.s32.totalorder %s288_s18, %s288_s18 }
  0x13   :  { %p295_p8 = por %p294_p7, %p293_p6 }
  0x15   :  { %p296_p9 = pnand %p295_p8, %p289_p5 }
  0x17   :  { %299 = shalt.err (!%p296_p9)
}
  0x18   :  { %33 = dma.hbm_to_vmem [thread:$0]  %s380_s1, 512, %s28_s17, [#allocation7], %s327_s12, %s327_s12, %s328_s13  }
  0x19   :  { %320 = dma.done.wait [#allocation4], 256  }
  0x1a   :  { %321 = vsyncadd [#allocation4], 4294967040 }
  0x1b   :  { %322 = dma.done.wait [#allocation7], 512  }
  0x1c   :  { %323 = vsyncadd [#allocation7], 4294966784  ;;  %vm45_vm0 = vcmask 523264   ;;  %v330_v0 = vmov 0.0   ;;  %v254_v1 = vld [vmem:[#allocation6 + $0x18] sm:$0xff]   ;;  %v255_v2 = vld [vmem:[#allocation6 + $0x10] sm:$0xff]  }
  0x1d   :  { %48 = vst.msk [vmem:[#allocation2 + $0x10] sm:$0xff] %vm45_vm0, %v330_v0  ;;  %46 = vst.msk [vmem:[#allocation2] sm:$0xff] %vm45_vm0, %v330_v0  ;;  %236 = vmatprep.subr.bf16.mxu0 %v254_v1  ;;  %v256_v3 = vld [vmem:[#allocation6 + $0x8] sm:$0xff]   ;;  %v258_v4 = vld [vmem:[#allocation3] sm:$0xff]   ;;  %vm191_vm1 = vcmask 519168   ;;  %s331_s0 = smov [#allocation8]  }
  0x1e   :  { %47 = vst.msk [vmem:[#allocation2 + $0x8] sm:$0xff] %vm45_vm0, %v330_v0  ;;  %49 = vst.msk [vmem:[#allocation2 + $0x18] sm:$0xff] %vm45_vm0, %v330_v0  ;;  %237 = vmatpush3.bf16.msra.mxu0 %v254_v1  ;;  %244 = vmatprep.mubr.msk.bf16.mxu0 %vm45_vm0, %v258_v4  ;;  %v257_v5 = vld [vmem:[#allocation6] sm:$0xff]   ;;  %v259_v6 = vld [vmem:[#allocation3 + $0x8] sm:$0xff]   ;;  %s201_s1 = sshll.u32 %s331_s0, 4  ;;  %s202_s1 = int_to_ptr.vmem [resolvable:$true] %s201_s1 }
  0x1f   :  { %238 = vmatprep.subr.bf16.mxu0 %v255_v2  ;;  %s300_s21 = scalar_lea.vmem %s202_s1, 256  ;;  %p305_p11 = scmp.lt.s32.totalorder %s202_s1, %s202_s1 }
  0x20   :  { %p301_p10 = scmp.ne.s32.totalorder %s202_s1, %s300_s21  ;;  %p306_p12 = scmp.lt.s32.totalorder %s300_s21, %s300_s21 }
  0x22   :  { %239 = vmatpush3.bf16.msra.mxu0 %v255_v2  ;;  %p307_p13 = por %p306_p12, %p305_p11 }
  0x23   :  { %240 = vmatprep.subr.bf16.mxu0 %v256_v3 }
  0x24   :  { %v52_v7 = vld [vmem:[#allocation2 + $0x10] sm:$0xff]  ;;  %v50_v9 = vld [vmem:[#allocation2] sm:$0xff]  ;;  %p308_p0 = pnand %p307_p13, %p301_p10 }
  0x25   :  { %v53_v12 = vld [vmem:[#allocation2 + $0x18] sm:$0xff]  ;;  %v51_v15 = vld [vmem:[#allocation2 + $0x8] sm:$0xff] }
  0x26   :  { %241 = vmatpush3.bf16.msra.mxu0 %v256_v3 }
  0x27   :  { %242 = vmatprep.subr.bf16.mxu0 %v257_v5 }
  0x2a   :  { %243 = vmatpush3.bf16.msra.mxu0 %v257_v5 }
  0x2d   :  { %245 = vmatmul.mubr.msk.bf16.vlgmr.msra.gmra.mxu0 %vm45_vm0, %v259_v6 }
  0xed   :  { %v246_v8 = vpop.f32.mrf.mxu0 }
  0xee   :  { %v158_v10 = vadd.f32 %v246_v8, %v52_v7 }
  0xef   :  { %v141_v11 = vpop.f32.mrf.mxu0 }
  0xf0   :  { %162 = vst.msk [vmem:[#allocation2 + $0x10] sm:$0xff] %vm45_vm0, %v158_v10  ;;  %v156_v13 = vadd.f32 %v141_v11, %v50_v9 }
  0xf1   :  { %v247_v14 = vpop.f32.mrf.mxu0 }
  0xf2   :  { %160 = vst.msk [vmem:[#allocation2] sm:$0xff] %vm45_vm0, %v156_v13  ;;  %v159_v16 = vadd.f32 %v247_v14, %v53_v12 }
  0xf3   :  { %v144_v17 = vpop.f32.mrf.mxu0 }
  0xf4   :  { %163 = vst.msk [vmem:[#allocation2 + $0x18] sm:$0xff] %vm45_vm0, %v159_v16  ;;  %v157_v18 = vadd.f32 %v144_v17, %v51_v15 }
  0xf6   :  { %161 = vst.msk [vmem:[#allocation2 + $0x8] sm:$0xff] %vm45_vm0, %v157_v18 }
  0xf7   :  { %v169_v19 = vld [vmem:[#allocation2 + $0x10] sm:$0xff] }
  0xf8   :  { %v173_v20 = vmul.f32 0.35355338, %v169_v19 }
  0xf9   :  { %v167_v21 = vld [vmem:[#allocation2] sm:$0xff] }
  0xfa   :  { %v171_v22 = vmul.f32 0.35355338, %v167_v21  ;;  %v228_v23 = vpack.c.bf16 %v173_v20, %v173_v20 }
  0xfb   :  { %v170_v24 = vld [vmem:[#allocation2 + $0x18] sm:$0xff] }
  0xfc   :  { %v174_v25 = vmul.f32 0.35355338, %v170_v24  ;;  %v226_v26 = vpack.c.bf16 %v171_v22, %v171_v22  ;;  %194 = vst.msk [vmem:[#allocation8 + $0x8] sm:$0xf] %vm191_vm1, %v228_v23 }
  0xfd   :  { %v168_v27 = vld [vmem:[#allocation2 + $0x8] sm:$0xff] }
  0xfe   :  { %v172_v28 = vmul.f32 0.35355338, %v168_v27  ;;  %v229_v29 = vpack.c.bf16 %v174_v25, %v174_v25  ;;  %192 = vst.msk [vmem:[#allocation8] sm:$0xf] %vm191_vm1, %v226_v26 }
 0x100   :  { %v227_v30 = vpack.c.bf16 %v172_v28, %v172_v28  ;;  %195 = vst.msk [vmem:[#allocation8 + $0xc] sm:$0xf] %vm191_vm1, %v229_v29 }
 0x102   :  { %193 = vst.msk [vmem:[#allocation8 + $0x4] sm:$0xf] %vm191_vm1, %v227_v30 }
 0x103   :  { %311 = shalt.err (!%p308_p0)
}
 0x104   :  { %207 = dma.vmem_to_hbm [thread:$0]  %s202_s1, 256, %s381_s2, [#allocation5], %s327_s12, %s327_s12, %s328_s13  }
 0x105   :  { %324 = dma.done.wait [#allocation5], 256  }
 0x106   :  { %325 = vsyncadd [#allocation5], 4294967040 }
 0x107   :  { %211 = vsyncpa [#allocation4], 1 }
 0x108   :  { %212 = vsyncpa [#allocation7], 1 }
 0x109   :  { %213 = vsyncpa [#allocation5], 1 }

</bundles_post_ra>
